<compile_context>
chip_gen: v6e
topology: v6e:2x2x1
jax: 0.10.0
libtpu: 0.0.40
codegen_flags: <defaults>
</compile_context>

<pallas_src>
import functools

import jax
import jax.numpy as jnp
from jax.experimental import pallas as pl
from jax.experimental.pallas import tpu as pltpu


def _round_up(n: int, m: int) -> int:
    return ((n + m - 1) // m) * m


def _classblock_kernel(x_ref, w_ref, b_ref, o_ref):
    """Eval path: LeakyReLU(0.1) -> Linear (x @ w + b)."""
    x = x_ref[...].astype(jnp.float32)
    x = jnp.where(x >= 0, x, jnp.float32(0.1) * x)          # LeakyReLU(0.1), f32 VPU math
    y = jnp.dot(x.astype(w_ref.dtype), w_ref[...],           # MXU: native-dtype in, f32 acc
                preferred_element_type=jnp.float32)
    o_ref[...] = (y + b_ref[...].astype(jnp.float32)).astype(o_ref.dtype)


def _classblock_dropout_kernel(x_ref, m_ref, w_ref, b_ref, o_ref):
    """Train path: LeakyReLU(0.1) -> Dropout (pre-scaled keep mask) -> Linear."""
    x = x_ref[...].astype(jnp.float32)
    x = jnp.where(x >= 0, x, jnp.float32(0.1) * x)
    x = x * m_ref[...].astype(jnp.float32)                   # inverted-dropout scaling baked in
    y = jnp.dot(x.astype(w_ref.dtype), w_ref[...],
                preferred_element_type=jnp.float32)
    o_ref[...] = (y + b_ref[...].astype(jnp.float32)).astype(o_ref.dtype)


def class_block_forward(x, weight, bias, *, p=0.5, training=False, rng_key=None):
    """Pallas wrapper mirroring ClassBlock.forward.

    x:      (B, input_dim)
    weight: (class_num, input_dim)   -- torch.nn.Linear layout
    bias:   (class_num,)
    """
    B, D = x.shape
    C, D2 = weight.shape
    assert D == D2 and bias.shape == (C,)

    # ---- layout plumbing (wrapper-side, once per call) ----
    w_t = jnp.transpose(weight)                    # (D, C): MXU consumes x @ w directly

    Cp = _round_up(C, 128)                         # lane-dense output columns
    tb = 128 if B >= 128 else _round_up(B, 8)      # batch tile (sublane multiple)
    Bp = _round_up(B, tb)
    tc = 256 if (Cp % 256 == 0) else 128           # column tile

    if Cp != C:
        w_t = jnp.pad(w_t, ((0, 0), (0, Cp - C)))
        bias_p = jnp.pad(bias, (0, Cp - C))
    else:
        bias_p = bias
    bias2d = bias_p.reshape(1, Cp)

    x_p = jnp.pad(x, ((0, Bp - B), (0, 0))) if Bp != B else x

    # grid = (column tiles, batch tiles): batch is the inner/fast axis so the weight
    # column tile stays VMEM-resident across the batch sweep.
    grid = (Cp // tc, Bp // tb)

    x_spec = pl.BlockSpec((tb, D), lambda j, i: (i, 0))
    w_spec = pl.BlockSpec((D, tc), lambda j, i: (0, j))
    b_spec = pl.BlockSpec((1, tc), lambda j, i: (0, j))
    o_spec = pl.BlockSpec((tb, tc), lambda j, i: (i, j))

    itemsize = jnp.dtype(x.dtype).itemsize
    cost = pl.CostEstimate(
        flops=2 * Bp * D * Cp,
        transcendentals=0,
        bytes_accessed=int(Bp * D * itemsize
                           + D * Cp * jnp.dtype(w_t.dtype).itemsize
                           + Bp * Cp * itemsize),
    )
    cparams = pltpu.CompilerParams(dimension_semantics=("parallel", "parallel"))

    use_dropout = bool(training) and float(p) > 0.0
    if use_dropout:
        if rng_key is None:
            rng_key = jax.random.PRNGKey(0)
        keep = jax.random.bernoulli(rng_key, 1.0 - float(p), (Bp, D))
        scaled_mask = keep.astype(x.dtype) * jnp.asarray(1.0 / (1.0 - float(p)), x.dtype)
        out_p = pl.pallas_call(
            _classblock_dropout_kernel,
            out_shape=jax.ShapeDtypeStruct((Bp, Cp), x.dtype),
            grid=grid,
            in_specs=[x_spec, x_spec, w_spec, b_spec],   # mask tiled exactly like x
            out_specs=o_spec,
            compiler_params=cparams,
            cost_estimate=cost,
        )(x_p, scaled_mask, w_t, bias2d)
    else:
        out_p = pl.pallas_call(
            _classblock_kernel,
            out_shape=jax.ShapeDtypeStruct((Bp, Cp), x.dtype),
            grid=grid,
            in_specs=[x_spec, w_spec, b_spec],
            out_specs=o_spec,
            compiler_params=cparams,
            cost_estimate=cost,
        )(x_p, w_t, bias2d)

    return out_p[:B, :C]


def init_class_block_params(key, input_dim, class_num):
    """weights_init_classifier: weight ~ N(0, 0.001), bias = 0."""
    w_key, _ = jax.random.split(key)
    weight = 0.001 * jax.random.normal(w_key, (class_num, input_dim), dtype=jnp.float32)
    bias = jnp.zeros((class_num,), dtype=jnp.float32)
    return weight, bias


if __name__ == "__main__":
    B, INPUT_DIM, CLASS_NUM = 8, 32, 16
    P_DROP = 0.5

    key = jax.random.PRNGKey(0)
    k_x, k_w, k_drop = jax.random.split(key, 3)

    x = jax.random.normal(k_x, (B, INPUT_DIM), dtype=jnp.float32)
    weight, bias = init_class_block_params(k_w, INPUT_DIM, CLASS_NUM)

    # --- eval mode (Dropout is identity) ---
    out = class_block_forward(x, weight, bias, p=P_DROP, training=False)
    out = jax.block_until_ready(out)

    x_act = jnp.where(x >= 0, x, 0.1 * x)
    ref = x_act @ weight.T + bias
    assert out.shape == (B, CLASS_NUM)
    assert jnp.allclose(out, ref, atol=1e-4, rtol=1e-4), float(jnp.max(jnp.abs(out - ref)))

    # --- train mode (dropout active; mask derived deterministically from k_drop) ---
    out_tr = class_block_forward(x, weight, bias, p=P_DROP, training=True, rng_key=k_drop)
    out_tr = jax.block_until_ready(out_tr)

    keep = jax.random.bernoulli(k_drop, 1.0 - P_DROP, (B, INPUT_DIM)).astype(jnp.float32)
    ref_tr = (x_act * keep * (1.0 / (1.0 - P_DROP))) @ weight.T + bias
    assert out_tr.shape == (B, CLASS_NUM)
    assert jnp.allclose(out_tr, ref_tr, atol=1e-4, rtol=1e-4), float(jnp.max(jnp.abs(out_tr - ref_tr)))

    print("KERNEL_OK")
</pallas_src>

<mosaic_0001>
module attributes {stable_mosaic.version = 11 : i64} {
  func.func @_classblock_kernel(%arg0: i32, %arg1: i32, %arg2: memref<8x32xf32, #tpu.memory_space<vmem>>, %arg3: memref<32x128xf32, #tpu.memory_space<vmem>>, %arg4: memref<1x128xf32, #tpu.memory_space<vmem>>, %arg5: memref<8x128xf32, #tpu.memory_space<vmem>>) attributes {dimension_semantics = [#tpu.dimension_semantics<parallel>, #tpu.dimension_semantics<parallel>], iteration_bounds = array<i64: 1, 1>, scalar_prefetch = 0 : i64, scratch_operands = 0 : i64, tpu.core_type = #tpu.core_type<tc>, window_params = [{transform_indices = @transform_0, window_bounds = array<i64: 8, 32>}, {transform_indices = @transform_1, window_bounds = array<i64: 32, 128>}, {transform_indices = @transform_2, window_bounds = array<i64: 1, 128>}, {transform_indices = @transform_3, window_bounds = array<i64: 8, 128>}]} {
    %c0 = arith.constant 0 : index
    %c0_0 = arith.constant 0 : index
    %0 = vector.load %arg2[%c0, %c0_0] : memref<8x32xf32, #tpu.memory_space<vmem>>, vector<8x32xf32>
    %cst = arith.constant 0.000000e+00 : f32
    %1 = vector.broadcast %cst : f32 to vector<8x32xf32>
    %2 = arith.cmpf oge, %0, %1 : vector<8x32xf32>
    %cst_1 = arith.constant 1.000000e-01 : f32
    %3 = vector.broadcast %cst_1 : f32 to vector<8x32xf32>
    %4 = arith.mulf %3, %0 : vector<8x32xf32>
    %5 = arith.select %2, %0, %4 : vector<8x32xi1>, vector<8x32xf32>
    %c0_2 = arith.constant 0 : index
    %c0_3 = arith.constant 0 : index
    %6 = vector.load %arg3[%c0_2, %c0_3] : memref<32x128xf32, #tpu.memory_space<vmem>>, vector<32x128xf32>
    %cst_4 = arith.constant dense<0.000000e+00> : vector<8x128xf32>
    %7 = tpu.matmul %5, %6, %cst_4 {dimension_numbers = #tpu.dot_dimension_numbers<[1], [0], [0], [1], [0, 0, 1, 1], [], []>} : vector<8x32xf32>, vector<32x128xf32>, vector<8x128xf32> -> vector<8x128xf32>
    %c0_5 = arith.constant 0 : index
    %c0_6 = arith.constant 0 : index
    %8 = vector.load %arg4[%c0_5, %c0_6] : memref<1x128xf32, #tpu.memory_space<vmem>>, vector<1x128xf32>
    %9 = vector.broadcast %8 : vector<1x128xf32> to vector<8x128xf32>
    %10 = arith.addf %7, %9 : vector<8x128xf32>
    %c0_7 = arith.constant 0 : index
    %c0_8 = arith.constant 0 : index
    %11 = vector.load %arg5[%c0_7, %c0_8] : memref<8x128xf32, #tpu.memory_space<vmem>>, vector<8x128xf32>
    tpu.vector_store %arg5[%c0_7, %c0_8], %10 {strides = array<i32>} : memref<8x128xf32, #tpu.memory_space<vmem>>, vector<8x128xf32>,
    return
  }
  func.func @transform_0(%arg0: i32, %arg1: i32) -> (i32, i32) {
    %c0_i32 = arith.constant 0 : i32
    %c0_i32_0 = arith.constant 0 : i32
    return %arg1, %c0_i32 : i32, i32
  }
  func.func @transform_1(%arg0: i32, %arg1: i32) -> (i32, i32) {
    %c0_i32 = arith.constant 0 : i32
    %c0_i32_0 = arith.constant 0 : i32
    return %c0_i32, %arg0 : i32, i32
  }
  func.func @transform_2(%arg0: i32, %arg1: i32) -> (i32, i32) {
    %c0_i32 = arith.constant 0 : i32
    %c0_i32_0 = arith.constant 0 : i32
    return %c0_i32, %arg0 : i32, i32
  }
  func.func @transform_3(%arg0: i32, %arg1: i32) -> (i32, i32) {
    %c0_i32 = arith.constant 0 : i32
    return %arg1, %arg0 : i32, i32
  }
}

</mosaic_0001>

<bundles_post_ra>
// kernel: tpu_custom_call.1
= control target key start
LH: loop header
LB: loop body
LE: loop exit
PB: predicated region body
PF: predicated region fallthrough
CT: control target
= control target key end

     0   :  { %8 = vsyncpa [#allocation3], 0  ;;  %s277_s0 = inlined_call_operand.hbm [shape: f32[8,32], index: 0, kind: input, shape index: {}]   ;;  %s278_s1 = inlined_call_operand.hbm [shape: f32[32,128], index: 1, kind: input, shape index: {}]   ;;  %s279_s2 = inlined_call_operand.vmem [shape: f32[1,128], index: 2, kind: input, shape index: {}]   ;;  %s280_s3 = inlined_call_operand.hbm [shape: f32[8,128], index: 3, kind: output, shape index: {}]  }
   0x1   :  { %9 = vsyncpa [#allocation6], 0 }
   0x2   :  { %10 = vsyncpa [#allocation4], 0  ;;  %s238_s12 = smov [#allocation2]   ;;  %s239_s14 = smov [#allocation5]  }
   0x3   :  { %s17_s13 = sshll.u32 %s238_s12, 4  ;;  %s26_s15 = sshll.u32 %s239_s14, 4  ;;  %s18_s13 = int_to_ptr.vmem [resolvable:$true] %s17_s13  ;;  %s27_s15 = int_to_ptr.vmem [resolvable:$true] %s26_s15 }
   0x4   :  { %s180_s16 = scalar_lea.vmem %s18_s13, 128  ;;  %p185_p1 = scmp.lt.s32.totalorder %s18_s13, %s18_s13 }
   0x5   :  { %p181_p0 = scmp.ne.s32.totalorder %s18_s13, %s180_s16  ;;  %p186_p2 = scmp.lt.s32.totalorder %s180_s16, %s180_s16 }
   0x7   :  { %p187_p3 = por %p186_p2, %p185_p1 }
   0x9   :  { %p188_p4 = pnand %p187_p3, %p181_p0 }
   0xb   :  { %191 = shalt.err (!%p188_p4)
}
   0xc   :  { %20 = dma.hbm_to_vmem [thread:$0]  %s277_s0, 128, %s18_s13, [#allocation3]  }
   0xd   :  { %s200_s19 = scalar_lea.vmem %s27_s15, 512  ;;  %p205_p6 = scmp.lt.s32.totalorder %s27_s15, %s27_s15 }
   0xe   :  { %p201_p5 = scmp.ne.s32.totalorder %s27_s15, %s200_s19  ;;  %p206_p7 = scmp.lt.s32.totalorder %s200_s19, %s200_s19 }
  0x10   :  { %p207_p8 = por %p206_p7, %p205_p6 }
  0x12   :  { %p208_p9 = pnand %p207_p8, %p201_p5 }
  0x14   :  { %211 = shalt.err (!%p208_p9)
}
  0x15   :  { %s240_s20 = smov 128   ;;  %s241_s21 = smov 8  }
  0x16   :  { %32 = dma.hbm_to_vmem [thread:$0]  %s278_s1, 512, %s27_s15, [#allocation6], %s240_s20, %s240_s20, %s241_s21  }
  0x17   :  { %232 = dma.done.wait [#allocation3], 128  }
  0x18   :  { %233 = vsyncadd [#allocation3], 4294967168 }
  0x19   :  { %234 = dma.done.wait [#allocation6], 512  }
  0x1a   :  { %235 = vsyncadd [#allocation6], 4294966784  ;;  %v242_v0 = vmov 0.0   ;;  %vm243_vm0 = vmmov 0   ;;  %v48_v1 = vld [vmem:[#allocation5 + $0x18] sm:$0xff]  ;;  %v47_v2 = vld [vmem:[#allocation5 + $0x10] sm:$0xff] }
  0x1b   :  { %154 = vmatprep.subr.mxu0 %v242_v0  ;;  %162 = vmatprep.mubr.msk.f32.mxu0 %vm243_vm0, %v242_v0  ;;  %v41_v3 = vld [vmem:[#allocation2] sm:$0xff]  ;;  %v46_v4 = vld [vmem:[#allocation5 + $0x8] sm:$0xff]  ;;  %v45_v6 = vld [vmem:[#allocation5] sm:$0xff]  ;;  %vm56_vm2 = vcmask 261120   ;;  %s244_s24 = smov [#allocation7]  }
  0x1c   :  { %155 = vmatpush3.msra.mxu0 %v48_v1  ;;  %vm42_vm1 = vcmp.ge.f32.partialorder %v41_v3, 0.0  ;;  %v43_v5 = vmul.f32 0.1, %v41_v3  ;;  %v147_v8 = vld [vmem:[%s279_s2] ss:$0 sm:$0xff]  ;;  %s137_s25 = sshll.u32 %s244_s24, 4  ;;  %s138_s25 = int_to_ptr.vmem [resolvable:$true] %s137_s25 }
  0x1d   :  { %156 = vmatprep.subr.mxu0 %v242_v0  ;;  %s212_s26 = scalar_lea.vmem %s138_s25, 128  ;;  %p217_p11 = scmp.lt.s32.totalorder %s138_s25, %s138_s25 }
  0x1e   :  { %157 = vmatpush3.msra.mxu0 %v47_v2  ;;  %v44_v7 = vsel %vm42_vm1, %v41_v3, %v43_v5  ;;  %p213_p10 = scmp.ne.s32.totalorder %s138_s25, %s212_s26  ;;  %p218_p12 = scmp.lt.s32.totalorder %s212_s26, %s212_s26 }
  0x1f   :  { %158 = vmatprep.subr.mxu0 %v242_v0 }
  0x20   :  { %159 = vmatpush3.msra.mxu0 %v46_v4  ;;  %p219_p13 = por %p218_p12, %p217_p11 }
  0x21   :  { %160 = vmatprep.subr.mxu0 %v242_v0 }
  0x22   :  { %161 = vmatpush3.msra.mxu0 %v45_v6  ;;  %p220_p0 = pnand %p219_p13, %p213_p10 }
  0x23   :  { %163 = vmatmul.mubr.msk.f32.vlgmr.msra.gmra.mxu0 %vm56_vm2, %v44_v7 }
  0xe3   :  { %v126_v9 = vpop.f32.mrf.mxu0 }
  0xe4   :  { %v127_v10 = vadd.f32 %v147_v8, %v126_v9 }
  0xe5   :  { %v164_v11 = vpop.f32.mrf.mxu0 }
  0xe6   :  { %130 = vst [vmem:[#allocation7] sm:$0xff] %v127_v10 }
  0xe7   :  { %223 = shalt.err (!%p220_p0)
}
  0xe8   :  { %140 = dma.vmem_to_hbm [thread:$0]  %s138_s25, 128, %s280_s3, [#allocation4]  }
  0xe9   :  { %236 = dma.done.wait [#allocation4], 128  }
  0xea   :  { %237 = vsyncadd [#allocation4], 4294967168 }
  0xeb   :  { %144 = vsyncpa [#allocation3], 1 }
  0xec   :  { %145 = vsyncpa [#allocation6], 1 }
  0xed   :  { %146 = vsyncpa [#allocation4], 1 }

</bundles_post_ra>
